<compile_context>
chip_gen: v7x
topology: tpu7x:2x2x1
jax: 0.10.0
libtpu: 0.0.40
codegen_flags: <defaults>
</compile_context>

<pallas_src>
import jax
import jax.numpy as jnp
from jax.experimental import pallas as pl
from jax.experimental.pallas import tpu as pltpu

TILE_B_MAX = 2048         # upper bound on rows per grid step (sweep at scale)
OUT_PAD = 128             # lane-dense padded logit width (true out_dim = 2)


def _round_up(x, m):
    return ((x + m - 1) // m) * m


def _pick_tile_b(batch, img_size):
    """Rows per grid step: multiple of 8 sublanes, VMEM-aware, >=2 steps when possible."""
    # Rough per-row VMEM footprint (bytes): double-buffered f32 x tile + its bf16
    # copy, f32+bf16 h1/h2, double-buffered f32 output tile.
    per_row = 10 * img_size + 6 * (1024 + 128) + 8 * OUT_PAD
    vmem_cap = max(8, ((36 << 20) // per_row) // 8 * 8)   # stay well under 48 MiB limit
    cap = min(TILE_B_MAX, vmem_cap)
    if batch <= 8:
        return 8
    # Prefer >= 2 grid steps so ("parallel",) can occupy both TensorCores on
    # v7x (single-TC v5e/v6e are unaffected).
    half = _round_up(-(-batch // 2), 8)
    return min(cap, half)


def _dnn_kernel(x_ref, w1_ref, b1_ref, w2_ref, b2_ref, w3_ref, b3_ref, o_ref):
    # Fused 3-layer MLP on one (tile_b, img_size) activation tile.
    # MXU matmuls: bf16 operands, f32 accumulation.  Epilogue (bias/ReLU): f32 VPU.
    x = x_ref[...].astype(jnp.bfloat16)

    h1 = jnp.dot(x, w1_ref[...], preferred_element_type=jnp.float32) + b1_ref[...]
    h1 = jnp.maximum(h1, 0.0)

    h2 = jnp.dot(h1.astype(jnp.bfloat16), w2_ref[...],
                 preferred_element_type=jnp.float32) + b2_ref[...]
    h2 = jnp.maximum(h2, 0.0)

    out = jnp.dot(h2.astype(jnp.bfloat16), w3_ref[...],
                  preferred_element_type=jnp.float32) + b3_ref[...]
    o_ref[...] = out.astype(o_ref.dtype)


def prepare_params(params):
    """One-time parameter prep (hoisted out of the per-call path).

    * Pads W3/b3 to a lane-dense OUT_PAD-wide slab (zero columns) so the final
      store is an unmasked, 128-lane-dense vst.
    * Casts weights to bf16 for the MXU; biases stay f32 for the f32 epilogue.
    Returns (kernel_params, out_dim).
    """
    w1, b1, w2, b2, w3, b3 = params
    out_dim = w3.shape[1]
    w3p = jnp.zeros((w3.shape[0], OUT_PAD), jnp.float32).at[:, :out_dim].set(w3)
    b3p = jnp.zeros((1, OUT_PAD), jnp.float32).at[:, :out_dim].set(b3)
    kernel_params = (
        w1.astype(jnp.bfloat16), b1.astype(jnp.float32),
        w2.astype(jnp.bfloat16), b2.astype(jnp.float32),
        w3p.astype(jnp.bfloat16), b3p.astype(jnp.float32),
    )
    return kernel_params, out_dim


def dnn_forward(x, kernel_params, out_dim=2):
    """Fused 3-layer MLP forward. x: (..., img_size) or anything reshapable."""
    w1, b1, w2, b2, w3p, b3p = kernel_params
    img_size = w1.shape[0]

    x2d = x.reshape(-1, img_size)          # matches x.view(-1, img_size); keep native dtype
    batch = x2d.shape[0]

    tile_b = _pick_tile_b(batch, img_size)
    grid = (pl.cdiv(batch, tile_b),)       # ragged edge block: OOB writes are masked

    batch_map = lambda i: (i, 0)           # activation / output tiles walk the batch
    const_map = lambda i: (0, 0)           # weights stay VMEM-resident

    h1_dim, h2_dim = w1.shape[1], w2.shape[1]
    flops = 2 * batch * (img_size * h1_dim + h1_dim * h2_dim + h2_dim * out_dim)
    bytes_accessed = (x2d.size * x2d.dtype.itemsize
                      + sum(a.size * a.dtype.itemsize for a in kernel_params)
                      + batch * OUT_PAD * 4)

    out = pl.pallas_call(
        _dnn_kernel,
        out_shape=jax.ShapeDtypeStruct((batch, OUT_PAD), jnp.float32),
        grid_spec=pltpu.PrefetchScalarGridSpec(
            num_scalar_prefetch=0,
            grid=grid,
            in_specs=[
                pl.BlockSpec((tile_b, img_size), batch_map),   # x tile (native dtype)
                pl.BlockSpec(w1.shape, const_map),             # W1 (img_size, 1024) bf16
                pl.BlockSpec(b1.shape, const_map),             # b1 (1, 1024) f32
                pl.BlockSpec(w2.shape, const_map),             # W2 (1024, 128) bf16
                pl.BlockSpec(b2.shape, const_map),             # b2 (1, 128) f32
                pl.BlockSpec(w3p.shape, const_map),            # W3 padded (128, 128) bf16
                pl.BlockSpec(b3p.shape, const_map),            # b3 padded (1, 128) f32
            ],
            out_specs=pl.BlockSpec((tile_b, OUT_PAD), batch_map),
        ),
        compiler_params=pltpu.CompilerParams(
            dimension_semantics=("parallel",),      # shard batch grid on v7x's 2 TCs
            vmem_limit_bytes=48 << 20,              # safe on v7x (64 MiB physical)
        ),
        cost_estimate=pl.CostEstimate(
            flops=flops, transcendentals=0, bytes_accessed=bytes_accessed),
    )(x2d, w1, b1, w2, b2, w3p, b3p)

    # Slice off the zero-padded logit columns (batch rows are already exact).
    return out[:, :out_dim]


def init_params(key, img_size):
    """Deterministic parameter init matching nn.Linear shapes.

    PyTorch stores weights as (out, in); we store the transpose (in, out)
    so the kernel computes x @ W + b (== PyTorch's x @ W^T + b) directly.
    """
    h1, h2, out = 64 * 4 * 4, 128, 2
    keys = jax.random.split(key, 6)

    def linear(kw, kb, fan_in, fan_out):
        bound = 1.0 / jnp.sqrt(fan_in)
        w = jax.random.uniform(kw, (fan_in, fan_out), jnp.float32, -bound, bound)
        b = jax.random.uniform(kb, (1, fan_out), jnp.float32, -bound, bound)
        return w, b

    w1, b1 = linear(keys[0], keys[1], img_size, h1)
    w2, b2 = linear(keys[2], keys[3], h1, h2)
    w3, b3 = linear(keys[4], keys[5], h2, out)
    return (w1, b1, w2, b2, w3, b3)


if __name__ == "__main__":
    key = jax.random.PRNGKey(0)
    k_params, k_x = jax.random.split(key)

    # img_size = 16*16 (flattened 16x16 single-channel image), batch = 2
    img_size = 16 * 16
    params = init_params(k_params, img_size)
    kernel_params, out_dim = prepare_params(params)       # one-time prep

    x = jax.random.normal(k_x, (2, 1, 16, 16), jnp.float32)  # NCHW-style input

    out = dnn_forward(x, kernel_params, out_dim)
    jax.block_until_ready(out)

    # Pure-JAX f32 reference (kernel matmuls are bf16 -> looser tolerance).
    w1, b1, w2, b2, w3, b3 = params
    xf = x.reshape(-1, img_size)
    ref = jnp.maximum(xf @ w1 + b1, 0.0)
    ref = jnp.maximum(ref @ w2 + b2, 0.0)
    ref = ref @ w3 + b3

    assert out.shape == (2, out_dim)
    assert jnp.allclose(out, ref, atol=3e-2, rtol=3e-2), (out, ref)

    print("KERNEL_OK")
</pallas_src>

<mosaic_0001>
module attributes {stable_mosaic.version = 11 : i64} {
  func.func @_dnn_kernel(%arg0: i32, %arg1: memref<8x256xf32, #tpu.memory_space<vmem>>, %arg2: memref<256x1024xbf16, #tpu.memory_space<vmem>>, %arg3: memref<1x1024xf32, #tpu.memory_space<vmem>>, %arg4: memref<1024x128xbf16, #tpu.memory_space<vmem>>, %arg5: memref<1x128xf32, #tpu.memory_space<vmem>>, %arg6: memref<128x128xbf16, #tpu.memory_space<vmem>>, %arg7: memref<1x128xf32, #tpu.memory_space<vmem>>, %arg8: memref<8x128xf32, #tpu.memory_space<vmem>>) attributes {dimension_semantics = [#tpu.dimension_semantics<parallel>], iteration_bounds = array<i64: 1>, scalar_prefetch = 0 : i64, scratch_operands = 0 : i64, tpu.core_type = #tpu.core_type<tc>, window_params = [{transform_indices = @transform_0, window_bounds = array<i64: 8, 256>}, {pipeline_mode = #tpu.pipeline_mode<synchronous>, transform_indices = @transform_1, window_bounds = array<i64: 256, 1024>}, {pipeline_mode = #tpu.pipeline_mode<synchronous>, transform_indices = @transform_2, window_bounds = array<i64: 1, 1024>}, {pipeline_mode = #tpu.pipeline_mode<synchronous>, transform_indices = @transform_3, window_bounds = array<i64: 1024, 128>}, {pipeline_mode = #tpu.pipeline_mode<synchronous>, transform_indices = @transform_4, window_bounds = array<i64: 1, 128>}, {pipeline_mode = #tpu.pipeline_mode<synchronous>, transform_indices = @transform_5, window_bounds = array<i64: 128, 128>}, {pipeline_mode = #tpu.pipeline_mode<synchronous>, transform_indices = @transform_6, window_bounds = array<i64: 1, 128>}, {transform_indices = @transform_7, window_bounds = array<i64: 8, 128>}]} {
    %c0 = arith.constant 0 : index
    %c0_0 = arith.constant 0 : index
    %0 = vector.load %arg1[%c0, %c0_0] : memref<8x256xf32, #tpu.memory_space<vmem>>, vector<8x256xf32>
    %1 = arith.truncf %0 : vector<8x256xf32> to vector<8x256xbf16>
    %c0_1 = arith.constant 0 : index
    %c0_2 = arith.constant 0 : index
    %2 = vector.load %arg2[%c0_1, %c0_2] : memref<256x1024xbf16, #tpu.memory_space<vmem>>, vector<256x1024xbf16>
    %cst = arith.constant dense<0.000000e+00> : vector<8x1024xf32>
    %3 = tpu.matmul %1, %2, %cst {dimension_numbers = #tpu.dot_dimension_numbers<[1], [0], [0], [1], [0, 0, 1, 1], [], []>} : vector<8x256xbf16>, vector<256x1024xbf16>, vector<8x1024xf32> -> vector<8x1024xf32>
    %c0_3 = arith.constant 0 : index
    %c0_4 = arith.constant 0 : index
    %4 = vector.load %arg3[%c0_3, %c0_4] : memref<1x1024xf32, #tpu.memory_space<vmem>>, vector<1x1024xf32>
    %5 = vector.broadcast %4 : vector<1x1024xf32> to vector<8x1024xf32>
    %6 = arith.addf %3, %5 : vector<8x1024xf32>
    %cst_5 = arith.constant 0.000000e+00 : f32
    %7 = vector.broadcast %cst_5 : f32 to vector<8x1024xf32>
    %8 = arith.maximumf %6, %7 : vector<8x1024xf32>
    %9 = arith.truncf %8 : vector<8x1024xf32> to vector<8x1024xbf16>
    %c0_6 = arith.constant 0 : index
    %c0_7 = arith.constant 0 : index
    %10 = vector.load %arg4[%c0_6, %c0_7] : memref<1024x128xbf16, #tpu.memory_space<vmem>>, vector<1024x128xbf16>
    %cst_8 = arith.constant dense<0.000000e+00> : vector<8x128xf32>
    %11 = tpu.matmul %9, %10, %cst_8 {dimension_numbers = #tpu.dot_dimension_numbers<[1], [0], [0], [1], [0, 0, 1, 1], [], []>} : vector<8x1024xbf16>, vector<1024x128xbf16>, vector<8x128xf32> -> vector<8x128xf32>
    %c0_9 = arith.constant 0 : index
    %c0_10 = arith.constant 0 : index
    %12 = vector.load %arg5[%c0_9, %c0_10] : memref<1x128xf32, #tpu.memory_space<vmem>>, vector<1x128xf32>
    %13 = vector.broadcast %12 : vector<1x128xf32> to vector<8x128xf32>
    %14 = arith.addf %11, %13 : vector<8x128xf32>
    %cst_11 = arith.constant 0.000000e+00 : f32
    %15 = vector.broadcast %cst_11 : f32 to vector<8x128xf32>
    %16 = arith.maximumf %14, %15 : vector<8x128xf32>
    %17 = arith.truncf %16 : vector<8x128xf32> to vector<8x128xbf16>
    %c0_12 = arith.constant 0 : index
    %c0_13 = arith.constant 0 : index
    %18 = vector.load %arg6[%c0_12, %c0_13] : memref<128x128xbf16, #tpu.memory_space<vmem>>, vector<128x128xbf16>
    %cst_14 = arith.constant dense<0.000000e+00> : vector<8x128xf32>
    %19 = tpu.matmul %17, %18, %cst_14 {dimension_numbers = #tpu.dot_dimension_numbers<[1], [0], [0], [1], [0, 0, 1, 1], [], []>} : vector<8x128xbf16>, vector<128x128xbf16>, vector<8x128xf32> -> vector<8x128xf32>
    %c0_15 = arith.constant 0 : index
    %c0_16 = arith.constant 0 : index
    %20 = vector.load %arg7[%c0_15, %c0_16] : memref<1x128xf32, #tpu.memory_space<vmem>>, vector<1x128xf32>
    %21 = vector.broadcast %20 : vector<1x128xf32> to vector<8x128xf32>
    %22 = arith.addf %19, %21 : vector<8x128xf32>
    %c0_17 = arith.constant 0 : index
    %c0_18 = arith.constant 0 : index
    %23 = vector.load %arg8[%c0_17, %c0_18] : memref<8x128xf32, #tpu.memory_space<vmem>>, vector<8x128xf32>
    tpu.vector_store %arg8[%c0_17, %c0_18], %22 {strides = array<i32>} : memref<8x128xf32, #tpu.memory_space<vmem>>, vector<8x128xf32>,
    return
  }
  func.func @transform_0(%arg0: i32) -> (i32, i32) {
    %c0_i32 = arith.constant 0 : i32
    %c0_i32_0 = arith.constant 0 : i32
    return %arg0, %c0_i32 : i32, i32
  }
  func.func @transform_1(%arg0: i32) -> (i32, i32) {
    %c0_i32 = arith.constant 0 : i32
    %c0_i32_0 = arith.constant 0 : i32
    %c0_i32_1 = arith.constant 0 : i32
    return %c0_i32, %c0_i32_0 : i32, i32
  }
  func.func @transform_2(%arg0: i32) -> (i32, i32) {
    %c0_i32 = arith.constant 0 : i32
    %c0_i32_0 = arith.constant 0 : i32
    %c0_i32_1 = arith.constant 0 : i32
    return %c0_i32, %c0_i32_0 : i32, i32
  }
  func.func @transform_3(%arg0: i32) -> (i32, i32) {
    %c0_i32 = arith.constant 0 : i32
    %c0_i32_0 = arith.constant 0 : i32
    %c0_i32_1 = arith.constant 0 : i32
    return %c0_i32, %c0_i32_0 : i32, i32
  }
  func.func @transform_4(%arg0: i32) -> (i32, i32) {
    %c0_i32 = arith.constant 0 : i32
    %c0_i32_0 = arith.constant 0 : i32
    %c0_i32_1 = arith.constant 0 : i32
    return %c0_i32, %c0_i32_0 : i32, i32
  }
  func.func @transform_5(%arg0: i32) -> (i32, i32) {
    %c0_i32 = arith.constant 0 : i32
    %c0_i32_0 = arith.constant 0 : i32
    %c0_i32_1 = arith.constant 0 : i32
    return %c0_i32, %c0_i32_0 : i32, i32
  }
  func.func @transform_6(%arg0: i32) -> (i32, i32) {
    %c0_i32 = arith.constant 0 : i32
    %c0_i32_0 = arith.constant 0 : i32
    %c0_i32_1 = arith.constant 0 : i32
    return %c0_i32, %c0_i32_0 : i32, i32
  }
  func.func @transform_7(%arg0: i32) -> (i32, i32) {
    %c0_i32 = arith.constant 0 : i32
    %c0_i32_0 = arith.constant 0 : i32
    return %arg0, %c0_i32 : i32, i32
  }
}

</mosaic_0001>

<bundles_post_ra>
// kernel: tpu_custom_call.1
= control target key start
LH: loop header
LB: loop body
LE: loop exit
PB: predicated region body
PF: predicated region fallthrough
CT: control target
= control target key end

     0   :  { %12 = vsyncpa [#allocation3], 0  ;;  %s2658_s0 = inlined_call_operand.hbm [shape: f32[2,256], index: 0, kind: input, shape index: {}]   ;;  %s2659_s1 = inlined_call_operand.hbm [shape: bf16[256,1024], index: 1, kind: input, shape index: {}]   ;;  %s2660_s2 = inlined_call_operand.hbm [shape: f32[1,1024], index: 2, kind: input, shape index: {}]   ;;  %s2661_s3 = inlined_call_operand.hbm [shape: bf16[1024,128], index: 3, kind: input, shape index: {}]   ;;  %s2662_s4 = inlined_call_operand.vmem [shape: f32[1,128], index: 4, kind: input, shape index: {}]   ;;  %s2663_s5 = inlined_call_operand.hbm [shape: bf16[128,128], index: 5, kind: input, shape index: {}]   ;;  %s2664_s6 = inlined_call_operand.vmem [shape: f32[1,128], index: 6, kind: input, shape index: {}]   ;;  %s2665_s7 = inlined_call_operand.hbm [shape: f32[2,128], index: 7, kind: output, shape index: {}]  }
   0x1   :  { %13 = vsyncpa [#allocation6], 0 }
   0x2   :  { %14 = vsyncpa [#allocation9], 0 }
   0x3   :  { %15 = vsyncpa [#allocation4], 0 }
   0x4   :  { %20 = vsyncadd [#allocation3], 192  ;;  %s2475_s24 = smov [#allocation5]   ;;  %s2335_s28 = scalar_lea.hbm %s2659_s1, 16384 }
   0x5   :  { %s33_s25 = sshll.u32 %s2475_s24, 4  ;;  %p2336_p0 = scmp.ne.s32.totalorder %s2659_s1, %s2335_s28  ;;  %s34_s25 = int_to_ptr.vmem [resolvable:$true] %s33_s25 }
   0x6   :  { %p2339_p1 = scmp.lt.u32.totalorder %s2335_s28, %s2659_s1 }
   0x8   :  { %p2341_p2 = pnand %p2339_p1, %p2336_p0 }
   0xa   :  { %2344 = shalt.err (!%p2341_p2)
}
   0xb   :  { %s2345_s10 = scalar_lea.vmem %s34_s25, 16384  ;;  %p2350_p4 = scmp.lt.s32.totalorder %s34_s25, %s34_s25 }
   0xc   :  { %p2346_p3 = scmp.ne.s32.totalorder %s34_s25, %s2345_s10  ;;  %p2351_p5 = scmp.lt.s32.totalorder %s2345_s10, %s2345_s10 }
   0xe   :  { %p2352_p6 = por %p2351_p5, %p2350_p4 }
  0x10   :  { %p2353_p7 = pnand %p2352_p6, %p2346_p3 }
  0x12   :  { %2356 = shalt.err (!%p2353_p7)
}
  0x13   :  { %s2476_s11 = smov 512   ;;  %s2477_s12 = smov 32  }
  0x14   :  { %39 = dma.hbm_to_vmem [thread:$0]  %s2659_s1, 16384, %s34_s25, [#allocation6], %s2476_s11, %s2476_s11, %s2477_s12  }
  0x15   :  { %s2478_s15 = smov [#allocation8]   ;;  %s2479_s17 = smov [#allocation2]  }
  0x16   :  { %s55_s16 = sshll.u32 %s2478_s15, 4  ;;  %s21_s18 = sshll.u32 %s2479_s17, 4  ;;  %s56_s16 = int_to_ptr.vmem [resolvable:$true] %s55_s16  ;;  %s22_s18 = int_to_ptr.vmem [resolvable:$true] %s21_s18 }
  0x17   :  { %s2357_s21 = scalar_lea.hbm %s2661_s3, 8192 }
  0x18   :  { %p2358_p8 = scmp.ne.s32.totalorder %s2661_s3, %s2357_s21  ;;  %p2361_p9 = scmp.lt.u32.totalorder %s2357_s21, %s2661_s3 }
  0x1a   :  { %p2363_p10 = pnand %p2361_p9, %p2358_p8 }
  0x1c   :  { %2366 = shalt.err (!%p2363_p10)
}
  0x1d   :  { %s2367_s1 = scalar_lea.vmem %s56_s16, 8192  ;;  %p2372_p12 = scmp.lt.s32.totalorder %s56_s16, %s56_s16 }
  0x1e   :  { %p2368_p11 = scmp.ne.s32.totalorder %s56_s16, %s2367_s1  ;;  %p2373_p13 = scmp.lt.s32.totalorder %s2367_s1, %s2367_s1 }
  0x20   :  { %p2374_p0 = por %p2373_p13, %p2372_p12 }
  0x22   :  { %p2375_p1 = pnand %p2374_p0, %p2368_p11 }
  0x24   :  { %2378 = shalt.err (!%p2375_p1)
}
  0x25   :  { %s2480_s25 = smov 64   ;;  %s2481_s27 = smov 4  }
  0x26   :  { %61 = dma.hbm_to_vmem [thread:$0]  %s2661_s3, 8192, %s56_s16, [#allocation9], %s2480_s25, %s2480_s25, %s2481_s27  }
  0x27   :  { %s2379_s9 = scalar_lea.hbm %s2658_s0, 64 }
  0x28   :  { %p2380_p2 = scmp.ne.s32.totalorder %s2658_s0, %s2379_s9  ;;  %p2383_p3 = scmp.lt.u32.totalorder %s2379_s9, %s2658_s0 }
  0x2a   :  { %p2385_p4 = pnand %p2383_p3, %p2380_p2 }
  0x2c   :  { %2388 = shalt.err (!%p2385_p4)
}
  0x2d   :  { %s2389_s15 = scalar_lea.vmem %s22_s18, 64  ;;  %s2393_s17 = scalar_lea.vmem %s22_s18, 256 }
  0x2e   :  { %p2390_p5 = scmp.ne.s32.totalorder %s22_s18, %s2389_s15  ;;  %p2394_p6 = scmp.lt.s32.totalorder %s22_s18, %s22_s18 }
  0x2f   :  { %p2395_p7 = scmp.lt.s32.totalorder %s2393_s17, %s2389_s15 }
  0x31   :  { %p2396_p8 = por %p2395_p7, %p2394_p6 }
  0x33   :  { %p2397_p9 = pnand %p2396_p8, %p2390_p5 }
  0x35   :  { %2400 = shalt.err (!%p2397_p9)
}
  0x36   :  { %27 = dma.hbm_to_vmem [thread:$0]  %s2658_s0, 64, %s22_s18, [#allocation3], %s2480_s25, %s2480_s25, %s2481_s27  }
  0x37   :  { %s2482_s19 = smov [#allocation7]   ;;  %s2483_s21 = smov [#allocation10]  }
  0x38   :  { %s46_s20 = sshll.u32 %s2482_s19, 4  ;;  %s69_s22 = sshll.u32 %s2483_s21, 4  ;;  %s47_s20 = int_to_ptr.vmem [resolvable:$true] %s46_s20  ;;  %s70_s22 = int_to_ptr.vmem [resolvable:$true] %s69_s22 }
  0x39   :  { %s2401_s26 = scalar_lea.hbm %s2660_s2, 128 }
  0x3a   :  { %p2402_p10 = scmp.ne.s32.totalorder %s2660_s2, %s2401_s26  ;;  %p2405_p11 = scmp.lt.u32.totalorder %s2401_s26, %s2660_s2 }
  0x3c   :  { %p2407_p12 = pnand %p2405_p11, %p2402_p10 }
  0x3e   :  { %2410 = shalt.err (!%p2407_p12)
}
  0x3f   :  { %s2411_s0 = scalar_lea.vmem %s47_s20, 128  ;;  %p2416_p0 = scmp.lt.s32.totalorder %s47_s20, %s47_s20 }
  0x40   :  { %p2412_p13 = scmp.ne.s32.totalorder %s47_s20, %s2411_s0  ;;  %p2417_p1 = scmp.lt.s32.totalorder %s2411_s0, %s2411_s0 }
  0x42   :  { %p2418_p2 = por %p2417_p1, %p2416_p0 }
  0x44   :  { %p2419_p3 = pnand %p2418_p2, %p2412_p13 }
  0x46   :  { %2422 = shalt.err (!%p2419_p3)
}
  0x47   :  { %49 = dma.hbm_to_vmem [thread:$0]  %s2660_s2, 128, %s47_s20, [#allocation6]  }
  0x48   :  { %s2423_s11 = scalar_lea.hbm %s2663_s5, 1024 }
  0x49   :  { %p2424_p4 = scmp.ne.s32.totalorder %s2663_s5, %s2423_s11  ;;  %p2427_p5 = scmp.lt.u32.totalorder %s2423_s11, %s2663_s5 }
  0x4b   :  { %p2429_p6 = pnand %p2427_p5, %p2424_p4 }
  0x4d   :  { %2432 = shalt.err (!%p2429_p6)
}
  0x4e   :  { %s2433_s3 = scalar_lea.vmem %s70_s22, 1024  ;;  %p2438_p8 = scmp.lt.s32.totalorder %s70_s22, %s70_s22 }
  0x4f   :  { %p2434_p7 = scmp.ne.s32.totalorder %s70_s22, %s2433_s3  ;;  %p2439_p9 = scmp.lt.s32.totalorder %s2433_s3, %s2433_s3 }
  0x51   :  { %p2440_p10 = por %p2439_p9, %p2438_p8 }
  0x53   :  { %p2441_p11 = pnand %p2440_p10, %p2434_p7 }
  0x55   :  { %2444 = shalt.err (!%p2441_p11)
}
  0x56   :  { %75 = dma.hbm_to_vmem [thread:$0]  %s2663_s5, 1024, %s70_s22, [#allocation9], %s2480_s25, %s2480_s25, %s2481_s27  }
  0x57   :  { %2467 = dma.done.wait [#allocation3], 256  }
  0x58   :  { %2468 = vsyncadd [#allocation3], 4294967040 }
  0x59   :  { %2469 = dma.done.wait [#allocation6], 16512  }
  0x5a   :  { %2470 = vsyncadd [#allocation6], 4294950784 }
  0x5b   :  { %2471 = dma.done.wait [#allocation9], 9216  }
  0x5c   :  { %2472 = vsyncadd [#allocation9], 4294958080  ;;  %v124_v0 = vld [vmem:[#allocation5] sm:$0xff]  ;;  %v125_v2 = vld [vmem:[#allocation5 + $0x8] sm:$0xff]  ;;  %v107_v35 = vlaneseq  ;;  %vm2485_vm0 = vmmov 0  }
  0x5d   :  { %v128_v1 = vld [vmem:[#allocation5 + $0x20] sm:$0xff]  ;;  %v129_v4 = vld [vmem:[#allocation5 + $0x28] sm:$0xff]  ;;  %v2600_v58 = vld.sshfl [vmem:[#allocation2] sm:$0xff pattern:$0x76325410] }
  0x5e   :  { %v1927_v3 = vcombine.high %v124_v0, %v128_v1  ;;  %v1926_v5 = vcombine.low %v124_v0, %v128_v1  ;;  %v132_v6 = vld [vmem:[#allocation5 + $0x40] sm:$0xff]  ;;  %v1929_v8 = vcombine.high %v125_v2, %v129_v4  ;;  %v1928_v9 = vcombine.low %v125_v2, %v129_v4  ;;  %v133_v11 = vld [vmem:[#allocation5 + $0x48] sm:$0xff]  ;;  %v2602_v61 = vld.sshfl [vmem:[#allocation2 + $0x8] sm:$0xff pattern:$0x76325410] }
  0x5f   :  { %v136_v7 = vld [vmem:[#allocation5 + $0x60] sm:$0xff]  ;;  %v137_v12 = vld [vmem:[#allocation5 + $0x68] sm:$0xff]  ;;  %v2598_v44 = vshrl.u32 %v107_v35, 7 }
  0x60   :  { %v1935_v10 = vcombine.high %v132_v6, %v136_v7  ;;  %v140_v13 = vld [vmem:[#allocation5 + $0x80] sm:$0xff]  ;;  %934 = vmatprep.subr.bf16.mxu0 %v1927_v3  ;;  %v1937_v14 = vcombine.high %v133_v11, %v137_v12  ;;  %v141_v16 = vld [vmem:[#allocation5 + $0x88] sm:$0xff]  ;;  %975 = vmatprep.subr.bf16.mxu1 %v1929_v8  ;;  %v1934_v18 = vcombine.low %v132_v6, %v136_v7 }
  0x61   :  { %v144_v15 = vld [vmem:[#allocation5 + $0xa0] sm:$0xff]  ;;  %v145_v17 = vld [vmem:[#allocation5 + $0xa8] sm:$0xff]  ;;  %935 = vmatpush1.bf16.msra.mxu0 %v1926_v5  ;;  %976 = vmatpush1.bf16.msra.mxu1 %v1928_v9  ;;  %v1936_v19 = vcombine.low %v133_v11, %v137_v12  ;;  %v119_v6 = vcombine.high %v2600_v58, %v2602_v61 }
  0x62   :  { %936 = vmatprep.subr.bf16.mxu0 %v1935_v10  ;;  %v1943_v20 = vcombine.high %v140_v13, %v144_v15  ;;  %977 = vmatprep.subr.bf16.mxu1 %v1937_v14  ;;  %v1945_v21 = vcombine.high %v141_v16, %v145_v17  ;;  %v148_v22 = vld [vmem:[#allocation5 + $0xc0] sm:$0xff]  ;;  %v149_v24 = vld [vmem:[#allocation5 + $0xc8] sm:$0xff]  ;;  %v1942_v26 = vcombine.low %v140_v13, %v144_v15 }
  0x63   :  { %v152_v23 = vld [vmem:[#allocation5 + $0xe0] sm:$0xff]  ;;  %v153_v25 = vld [vmem:[#allocation5 + $0xe8] sm:$0xff]  ;;  %v1944_v27 = vcombine.low %v141_v16, %v145_v17  ;;  %v2606_v10 = vpack.c.bf16 %v119_v6, %v119_v6 }
  0x64   :  { %v1951_v28 = vcombine.high %v148_v22, %v152_v23  ;;  %v1953_v29 = vcombine.high %v149_v24, %v153_v25  ;;  %v156_v30 = vld [vmem:[#allocation5 + $0x100] sm:$0xff]  ;;  %v157_v32 = vld [vmem:[#allocation5 + $0x108] sm:$0xff]  ;;  %v1950_v34 = vcombine.low %v148_v22, %v152_v23  ;;  %v1952_v36 = vcombine.low %v149_v24, %v153_v25 }
  0x65   :  { %937 = vmatpush1.bf16.msra.mxu0 %v1934_v18  ;;  %978 = vmatpush1.bf16.msra.mxu1 %v1936_v19  ;;  %v160_v31 = vld [vmem:[#allocation5 + $0x120] sm:$0xff]  ;;  %v161_v33 = vld [vmem:[#allocation5 + $0x128] sm:$0xff] }
  0x66   :  { %938 = vmatprep.subr.bf16.mxu0 %v1943_v20  ;;  %979 = vmatprep.subr.bf16.mxu1 %v1945_v21  ;;  %v1959_v37 = vcombine.high %v156_v30, %v160_v31  ;;  %v1961_v38 = vcombine.high %v157_v32, %v161_v33  ;;  %v164_v39 = vld [vmem:[#allocation5 + $0x140] sm:$0xff]  ;;  %v165_v41 = vld [vmem:[#allocation5 + $0x148] sm:$0xff]  ;;  %v1958_v43 = vcombine.low %v156_v30, %v160_v31 }
  0x67   :  { %v168_v40 = vld [vmem:[#allocation5 + $0x160] sm:$0xff]  ;;  %v169_v42 = vld [vmem:[#allocation5 + $0x168] sm:$0xff]  ;;  %v1960_v45 = vcombine.low %v157_v32, %v161_v33  ;;  %966 = vmatprep.mubr.bf16.mxu0 %v2606_v10  ;;  %1007 = vmatprep.mubr.bf16.mxu1 %v2606_v10 }
  0x68   :  { %v1967_v46 = vcombine.high %v164_v39, %v168_v40  ;;  %v1969_v47 = vcombine.high %v165_v41, %v169_v42  ;;  %v172_v48 = vld [vmem:[#allocation5 + $0x180] sm:$0xff]  ;;  %v173_v50 = vld [vmem:[#allocation5 + $0x188] sm:$0xff]  ;;  %v1966_v52 = vcombine.low %v164_v39, %v168_v40  ;;  %v1968_v54 = vcombine.low %v165_v41, %v169_v42 }
  0x69   :  { %939 = vmatpush1.bf16.msra.mxu0 %v1942_v26  ;;  %980 = vmatpush1.bf16.msra.mxu1 %v1944_v27  ;;  %v176_v49 = vld [vmem:[#allocation5 + $0x1a0] sm:$0xff]  ;;  %v177_v51 = vld [vmem:[#allocation5 + $0x1a8] sm:$0xff] }
  0x6a   :  { %940 = vmatprep.subr.bf16.mxu0 %v1951_v28  ;;  %981 = vmatprep.subr.bf16.mxu1 %v1953_v29  ;;  %v180_v53 = vld [vmem:[#allocation5 + $0x1c0] sm:$0xff]  ;;  %v1975_v55 = vcombine.high %v172_v48, %v176_v49  ;;  %v1977_v57 = vcombine.high %v173_v50, %v177_v51  ;;  %v181_v59 = vld [vmem:[#allocation5 + $0x1c8] sm:$0xff]  ;;  %v1974_v62 = vcombine.low %v172_v48, %v176_v49 }
  0x6b   :  { %v184_v56 = vld [vmem:[#allocation5 + $0x1e0] sm:$0xff]  ;;  %v185_v60 = vld [vmem:[#allocation5 + $0x1e8] sm:$0xff]  ;;  %v1976_v63 = vcombine.low %v173_v50, %v177_v51 }
  0x6c   :  { %v1983_v0 = vcombine.high %v180_v53, %v184_v56  ;;  %v1985_v1 = vcombine.high %v181_v59, %v185_v60  ;;  %v188_v2 = vld [vmem:[#allocation5 + $0x200] sm:$0xff]  ;;  %v189_v4 = vld [vmem:[#allocation5 + $0x208] sm:$0xff]  ;;  %v1982_v7 = vcombine.low %v180_v53, %v184_v56  ;;  %v1984_v8 = vcombine.low %v181_v59, %v185_v60 }
  0x6d   :  { %941 = vmatpush1.bf16.msra.mxu0 %v1950_v34  ;;  %982 = vmatpush1.bf16.msra.mxu1 %v1952_v36  ;;  %v192_v3 = vld [vmem:[#allocation5 + $0x220] sm:$0xff]  ;;  %v193_v5 = vld [vmem:[#allocation5 + $0x228] sm:$0xff] }
  0x6e   :  { %942 = vmatprep.subr.bf16.mxu0 %v1959_v37  ;;  %983 = vmatprep.subr.bf16.mxu1 %v1961_v38  ;;  %v1991_v9 = vcombine.high %v188_v2, %v192_v3  ;;  %v1993_v11 = vcombine.high %v189_v4, %v193_v5  ;;  %v196_v12 = vld [vmem:[#allocation5 + $0x240] sm:$0xff]  ;;  %v197_v14 = vld [vmem:[#allocation5 + $0x248] sm:$0xff]  ;;  %v1990_v16 = vcombine.low %v188_v2, %v192_v3 }
  0x6f   :  { %v200_v13 = vld [vmem:[#allocation5 + $0x260] sm:$0xff]  ;;  %v201_v15 = vld [vmem:[#allocation5 + $0x268] sm:$0xff]  ;;  %v1992_v17 = vcombine.low %v189_v4, %v193_v5  ;;  %v126_v4 = vld [vmem:[#allocation5 + $0x10] sm:$0xff] }
  0x70   :  { %v1999_v18 = vcombine.high %v196_v12, %v200_v13  ;;  %v2001_v19 = vcombine.high %v197_v14, %v201_v15  ;;  %v204_v20 = vld [vmem:[#allocation5 + $0x280] sm:$0xff]  ;;  %v205_v22 = vld [vmem:[#allocation5 + $0x288] sm:$0xff]  ;;  %v1998_v24 = vcombine.low %v196_v12, %v200_v13  ;;  %v2000_v25 = vcombine.low %v197_v14, %v201_v15  ;;  %v131_v12 = vld [vmem:[#allocation5 + $0x38] sm:$0xff] }
  0x71   :  { %943 = vmatpush1.bf16.msra.mxu0 %v1958_v43  ;;  %984 = vmatpush1.bf16.msra.mxu1 %v1960_v45  ;;  %v208_v21 = vld [vmem:[#allocation5 + $0x2a0] sm:$0xff]  ;;  %v209_v23 = vld [vmem:[#allocation5 + $0x2a8] sm:$0xff]  ;;  %v134_v14 = vld [vmem:[#allocation5 + $0x50] sm:$0xff] }
  0x72   :  { %944 = vmatprep.subr.bf16.mxu0 %v1967_v46  ;;  %985 = vmatprep.subr.bf16.mxu1 %v1969_v47  ;;  %v2007_v26 = vcombine.high %v204_v20, %v208_v21  ;;  %v2009_v27 = vcombine.high %v205_v22, %v209_v23  ;;  %v212_v28 = vld [vmem:[#allocation5 + $0x2c0] sm:$0xff]  ;;  %v213_v30 = vld [vmem:[#allocation5 + $0x2c8] sm:$0xff]  ;;  %v2006_v32 = vcombine.low %v204_v20, %v208_v21  ;;  %v139_v21 = vld [vmem:[#allocation5 + $0x78] sm:$0xff] }
  0x73   :  { %v216_v29 = vld [vmem:[#allocation5 + $0x2e0] sm:$0xff]  ;;  %v217_v31 = vld [vmem:[#allocation5 + $0x2e8] sm:$0xff]  ;;  %v2008_v33 = vcombine.low %v205_v22, %v209_v23  ;;  %v142_v23 = vld [vmem:[#allocation5 + $0x90] sm:$0xff] }
  0x74   :  { %v2015_v34 = vcombine.high %v212_v28, %v216_v29  ;;  %v2017_v35 = vcombine.high %v213_v30, %v217_v31  ;;  %v220_v36 = vld [vmem:[#allocation5 + $0x300] sm:$0xff]  ;;  %v221_v38 = vld [vmem:[#allocation5 + $0x308] sm:$0xff]  ;;  %v2014_v40 = vcombine.low %v212_v28, %v216_v29  ;;  %v2016_v42 = vcombine.low %v213_v30, %v217_v31  ;;  %v150_v29 = vld [vmem:[#allocation5 + $0xd0] sm:$0xff] }
  0x75   :  { %945 = vmatpush1.bf16.msra.mxu0 %v1966_v52  ;;  %986 = vmatpush1.bf16.msra.mxu1 %v1968_v54  ;;  %v224_v37 = vld [vmem:[#allocation5 + $0x320] sm:$0xff]  ;;  %v225_v39 = vld [vmem:[#allocation5 + $0x328] sm:$0xff]  ;;  %v154_v30 = vld [vmem:[#allocation5 + $0xf0] sm:$0xff] }
  0x76   :  { %946 = vmatprep.subr.bf16.mxu0 %v1975_v55  ;;  %987 = vmatprep.subr.bf16.mxu1 %v1977_v57  ;;  %v228_v41 = vld [vmem:[#allocation5 + $0x340] sm:$0xff]  ;;  %v2023_v43 = vcombine.high %v220_v36, %v224_v37  ;;  %v2025_v46 = vcombine.high %v221_v38, %v225_v39  ;;  %v229_v47 = vld [vmem:[#allocation5 + $0x348] sm:$0xff]  ;;  %v2022_v49 = vcombine.low %v220_v36, %v224_v37  ;;  %v158_v37 = vld [vmem:[#allocation5 + $0x110] sm:$0xff] }
  0x77   :  { %v232_v45 = vld [vmem:[#allocation5 + $0x360] sm:$0xff]  ;;  %v233_v48 = vld [vmem:[#allocation5 + $0x368] sm:$0xff]  ;;  %v2024_v51 = vcombine.low %v221_v38, %v225_v39  ;;  %v162_v38 = vld [vmem:[#allocation5 + $0x130] sm:$0xff] }
  0x78   :  { %v236_v50 = vld [vmem:[#allocation5 + $0x380] sm:$0xff]  ;;  %v2031_v52 = vcombine.high %v228_v41, %v232_v45  ;;  %v2033_v54 = vcombine.high %v229_v47, %v233_v48  ;;  %v237_v55 = vld [vmem:[#allocation5 + $0x388] sm:$0xff]  ;;  %v2030_v57 = vcombine.low %v228_v41, %v232_v45  ;;  %v2032_v60 = vcombine.low %v229_v47, %v233_v48  ;;  %v159_v41 = vld [vmem:[#allocation5 + $0x118] sm:$0xff] }
  0x79   :  { %947 = vmatpush1.bf16.msra.mxu0 %v1974_v62  ;;  %988 = vmatpush1.bf16.msra.mxu1 %v1976_v63  ;;  %v240_v53 = vld [vmem:[#allocation5 + $0x3a0] sm:$0xff]  ;;  %v241_v56 = vld [vmem:[#allocation5 + $0x3a8] sm:$0xff]  ;;  %v1954_v45 = vcombine.low %v150_v29, %v154_v30  ;;  %v170_v47 = vld [vmem:[#allocation5 + $0x170] sm:$0xff] }
  0x7a   :  { %948 = vmatprep.subr.bf16.mxu0 %v1983_v0  ;;  %989 = vmatprep.subr.bf16.mxu1 %v1985_v1  ;;  %v244_v59 = vld [vmem:[#allocation5 + $0x3c0] sm:$0xff]  ;;  %v2039_v62 = vcombine.high %v236_v50, %v240_v53  ;;  %v2041_v0 = vcombine.high %v237_v55, %v241_v56  ;;  %v245_v1 = vld [vmem:[#allocation5 + $0x3c8] sm:$0xff]  ;;  %v2038_v3 = vcombine.low %v236_v50, %v240_v53  ;;  %v171_v50 = vld [vmem:[#allocation5 + $0x178] sm:$0xff] }
  0x7b   :  { %v248_v63 = vld [vmem:[#allocation5 + $0x3e0] sm:$0xff]  ;;  %v249_v2 = vld [vmem:[#allocation5 + $0x3e8] sm:$0xff]  ;;  %v2040_v5 = vcombine.low %v237_v55, %v241_v56  ;;  %v174_v53 = vld [vmem:[#allocation5 + $0x190] sm:$0xff] }
  0x7c   :  { %v2047_v6 = vcombine.high %v244_v59, %v248_v63  ;;  %v2046_v13 = vcombine.low %v244_v59, %v248_v63  ;;  %v2048_v15 = vcombine.low %v245_v1, %v249_v2  ;;  %v179_v59 = vld [vmem:[#allocation5 + $0x1b8] sm:$0xff]  ;;  %v182_v63 = vld [vmem:[#allocation5 + $0x1d0] sm:$0xff] }
  0x7d   :  { %949 = vmatpush1.bf16.msra.mxu0 %v1982_v7  ;;  %990 = vmatpush1.bf16.msra.mxu1 %v1984_v8  ;;  %v130_v7 = vld [vmem:[#allocation5 + $0x30] sm:$0xff]  ;;  %v2049_v8 = vcombine.high %v245_v1, %v249_v2 }
  0x7e   :  { %950 = vmatprep.subr.bf16.mxu0 %v1991_v9  ;;  %991 = vmatprep.subr.bf16.mxu1 %v1993_v11  ;;  %v127_v9 = vld [vmem:[#allocation5 + $0x18] sm:$0xff]  ;;  %v118_v11 = vcombine.low %v2600_v58, %v2602_v61  ;;  %v1930_v22 = vcombine.low %v126_v4, %v130_v7 }
  0x7f   :  { %v1932_v58 = vcombine.low %v127_v9, %v131_v12 }
  0x80   :  { %v2612_v20 = vpack.c.bf16 %v118_v11, %v118_v11 }
  0x81   :  { %951 = vmatpush1.bf16.msra.mxu0 %v1990_v16  ;;  %992 = vmatpush1.bf16.msra.mxu1 %v1992_v17  ;;  %v1931_v16 = vcombine.high %v126_v4, %v130_v7  ;;  %v138_v17 = vld [vmem:[#allocation5 + $0x70] sm:$0xff]  ;;  %v187_v4 = vld [vmem:[#allocation5 + $0x1f8] sm:$0xff] }
  0x82   :  { %952 = vmatprep.subr.bf16.mxu0 %v1999_v18  ;;  %993 = vmatprep.subr.bf16.mxu1 %v2001_v19  ;;  %v1933_v18 = vcombine.high %v127_v9, %v131_v12  ;;  %v135_v19 = vld [vmem:[#allocation5 + $0x58] sm:$0xff]  ;;  %v1939_v61 = vcombine.high %v134_v14, %v138_v17  ;;  %v1938_v28 = vcombine.low %v134_v14, %v138_v17  ;;  %v190_v7 = vld [vmem:[#allocation5 + $0x210] sm:$0xff] }
  0x83   :  { %v1940_v31 = vcombine.low %v135_v19, %v139_v21  ;;  %v191_v12 = vld [vmem:[#allocation5 + $0x218] sm:$0xff]  ;;  %v202_v17 = vld [vmem:[#allocation5 + $0x270] sm:$0xff] }
  0x85   :  { %953 = vmatpush1.bf16.msra.mxu0 %v1998_v24  ;;  %994 = vmatpush1.bf16.msra.mxu1 %v2000_v25  ;;  %v146_v24 = vld [vmem:[#allocation5 + $0xb0] sm:$0xff]  ;;  %v1941_v25 = vcombine.high %v135_v19, %v139_v21  ;;  %v199_v21 = vld [vmem:[#allocation5 + $0x258] sm:$0xff] }
  0x86   :  { %954 = vmatprep.subr.bf16.mxu0 %v2007_v26  ;;  %995 = vmatprep.subr.bf16.mxu1 %v2009_v27  ;;  %v143_v26 = vld [vmem:[#allocation5 + $0x98] sm:$0xff]  ;;  %v1946_v36 = vcombine.low %v142_v23, %v146_v24 }
  0x87   :  { %v147_v27 = vld [vmem:[#allocation5 + $0xb8] sm:$0xff] }
  0x88   :  { %v1948_v39 = vcombine.low %v143_v26, %v147_v27 }
  0x89   :  { %955 = vmatpush1.bf16.msra.mxu0 %v2006_v32  ;;  %996 = vmatpush1.bf16.msra.mxu1 %v2008_v33  ;;  %v1947_v32 = vcombine.high %v142_v23, %v146_v24  ;;  %v151_v33 = vld [vmem:[#allocation5 + $0xd8] sm:$0xff]  ;;  %v210_v24 = vld [vmem:[#allocation5 + $0x2b0] sm:$0xff] }
  0x8a   :  { %956 = vmatprep.subr.bf16.mxu0 %v2015_v34  ;;  %997 = vmatprep.subr.bf16.mxu1 %v2017_v35  ;;  %v155_v34 = vld [vmem:[#allocation5 + $0xf8] sm:$0xff]  ;;  %v1949_v35 = vcombine.high %v143_v26, %v147_v27 }
  0x8b   :  { %v1956_v48 = vcombine.low %v151_v33, %v155_v34  ;;  %v207_v27 = vld [vmem:[#allocation5 + $0x298] sm:$0xff] }
  0x8d   :  { %957 = vmatpush1.bf16.msra.mxu0 %v2014_v40  ;;  %998 = vmatpush1.bf16.msra.mxu1 %v2016_v42  ;;  %v1955_v40 = vcombine.high %v150_v29, %v154_v30  ;;  %v163_v42 = vld [vmem:[#allocation5 + $0x138] sm:$0xff] }
  0x8e   :  { %958 = vmatprep.subr.bf16.mxu0 %v2023_v43  ;;  %999 = vmatprep.subr.bf16.mxu1 %v2025_v46  ;;  %v1957_v43 = vcombine.high %v151_v33, %v155_v34  ;;  %v166_v46 = vld [vmem:[#allocation5 + $0x150] sm:$0xff]  ;;  %v1964_v55 = vcombine.low %v159_v41, %v163_v42 }
  0x8f   :  { %v1971_v56 = vcombine.high %v166_v46, %v170_v47  ;;  %v214_v34 = vld [vmem:[#allocation5 + $0x2d0] sm:$0xff] }
  0x91   :  { %959 = vmatpush1.bf16.msra.mxu0 %v2022_v49  ;;  %1000 = vmatpush1.bf16.msra.mxu1 %v2024_v51  ;;  %v167_v49 = vld [vmem:[#allocation5 + $0x158] sm:$0xff]  ;;  %v1965_v51 = vcombine.high %v159_v41, %v163_v42  ;;  %v222_v42 = vld [vmem:[#allocation5 + $0x310] sm:$0xff] }
  0x92   :  { %960 = vmatprep.subr.bf16.mxu0 %v2031_v52  ;;  %1001 = vmatprep.subr.bf16.mxu1 %v2033_v54  ;;  %v1962_v52 = vcombine.low %v158_v37, %v162_v38  ;;  %v178_v54 = vld [vmem:[#allocation5 + $0x1b0] sm:$0xff]  ;;  %v1972_v1 = vcombine.low %v167_v49, %v171_v50 }
  0x93   :  { %v1979_v2 = vcombine.high %v174_v53, %v178_v54 }
  0x95   :  { %961 = vmatpush1.bf16.msra.mxu0 %v2030_v57  ;;  %1002 = vmatpush1.bf16.msra.mxu1 %v2032_v60  ;;  %v175_v57 = vld [vmem:[#allocation5 + $0x198] sm:$0xff]  ;;  %v1973_v60 = vcombine.high %v167_v49, %v171_v50  ;;  %v230_v50 = vld [vmem:[#allocation5 + $0x350] sm:$0xff] }
  0x96   :  { %962 = vmatprep.subr.bf16.mxu0 %v2039_v62  ;;  %1003 = vmatprep.subr.bf16.mxu1 %v2041_v0  ;;  %v1970_v62 = vcombine.low %v166_v46, %v170_v47  ;;  %v186_v0 = vld [vmem:[#allocation5 + $0x1f0] sm:$0xff]  ;;  %v1980_v9 = vcombine.low %v175_v57, %v179_v59  ;;  %v227_v46 = vld [vmem:[#allocation5 + $0x338] sm:$0xff] }
  0x97   :  { %v1987_v11 = vcombine.high %v182_v63, %v186_v0 }
  0x99   :  { %963 = vmatpush1.bf16.msra.mxu0 %v2038_v3  ;;  %1004 = vmatpush1.bf16.msra.mxu1 %v2040_v5  ;;  %v183_v3 = vld [vmem:[#allocation5 + $0x1d8] sm:$0xff]  ;;  %v1981_v5 = vcombine.high %v175_v57, %v179_v59  ;;  %v238_v59 = vld [vmem:[#allocation5 + $0x390] sm:$0xff] }
  0x9a   :  { %964 = vmatprep.subr.bf16.mxu0 %v2047_v6  ;;  %1005 = vmatprep.subr.bf16.mxu1 %v2049_v8  ;;  %v1978_v6 = vcombine.low %v174_v53, %v178_v54  ;;  %v194_v8 = vld [vmem:[#allocation5 + $0x230] sm:$0xff]  ;;  %v1989_v14 = vcombine.high %v183_v3, %v187_v4  ;;  %v235_v53 = vld [vmem:[#allocation5 + $0x378] sm:$0xff] }
  0x9b   :  { %v1995_v19 = vcombine.high %v190_v7, %v194_v8 }
  0x9d   :  { %965 = vmatpush1.bf16.msra.mxu0 %v2046_v13  ;;  %1006 = vmatpush1.bf16.msra.mxu1 %v2048_v15  ;;  %v195_v13 = vld [vmem:[#allocation5 + $0x238] sm:$0xff]  ;;  %v1986_v15 = vcombine.low %v182_v63, %v186_v0 }
  0x9e   :  { %1016 = vmatprep.subr.bf16.mxu0 %v1931_v16  ;;  %1057 = vmatprep.subr.bf16.mxu1 %v1933_v18  ;;  %v198_v16 = vld [vmem:[#allocation5 + $0x250] sm:$0xff]  ;;  %v1988_v18 = vcombine.low %v183_v3, %v187_v4  ;;  %v1997_v23 = vcombine.high %v191_v12, %v195_v13  ;;  %v243_v63 = vld [vmem:[#allocation5 + $0x3b8] sm:$0xff] }
  0x9f   :  { %v2003_v26 = vcombine.high %v198_v16, %v202_v17  ;;  %v2002_v30 = vcombine.low %v198_v16, %v202_v17  ;;  %v246_v4 = vld [vmem:[#allocation5 + $0x3d0] sm:$0xff]  ;;  %v2262_v16 = vld [vmem:[#allocation8 + $0xc0] sm:$0xff]  }
  0xa0   :  { %967 = vmatmul.mubr.bf16.vlgmr.msra.gmra.mrb[0].mxu0 %v2612_v20  ;;  %1008 = vmatmul.mubr.bf16.vlgmr.msra.gmra.mrb[0].mxu1 %v2612_v20  ;;  %v2263_v17 = vld [vmem:[#allocation8] sm:$0xff]  }
  0xa1   :  { %1017 = vmatpush1.bf16.msra.mxu0 %v1930_v22  ;;  %1058 = vmatpush1.bf16.msra.mxu1 %v1932_v58  ;;  %v203_v22 = vld [vmem:[#allocation5 + $0x278] sm:$0xff]  ;;  %v1994_v58 = vcombine.low %v190_v7, %v194_v8 }
  0xa2   :  { %1018 = vmatprep.subr.bf16.mxu0 %v1939_v61  ;;  %1059 = vmatprep.subr.bf16.mxu1 %v1941_v25  ;;  %v206_v61 = vld [vmem:[#allocation5 + $0x290] sm:$0xff]  ;;  %v1996_v25 = vcombine.low %v191_v12, %v195_v13  ;;  %v2005_v29 = vcombine.high %v199_v21, %v203_v22  ;;  %v251_v7 = vld [vmem:[#allocation5 + $0x3f8] sm:$0xff] }
  0xa3   :  { %1048 = vmatprep.mubr.bf16.mxu0 %v2606_v10  ;;  %1089 = vmatprep.mubr.bf16.mxu1 %v2606_v10  ;;  %v1963_v10 = vcombine.high %v158_v37, %v162_v38  ;;  %v219_v37 = vld [vmem:[#allocation5 + $0x2f8] sm:$0xff]  ;;  %v2010_v38 = vcombine.low %v206_v61, %v210_v24 }
  0xa5   :  { %1019 = vmatpush1.bf16.msra.mxu0 %v1938_v28  ;;  %1060 = vmatpush1.bf16.msra.mxu1 %v1940_v31  ;;  %v211_v28 = vld [vmem:[#allocation5 + $0x2b8] sm:$0xff]  ;;  %v2004_v31 = vcombine.low %v199_v21, %v203_v22  ;;  %v2266_v21 = vld [vmem:[#allocation8 + $0xc8] sm:$0xff]  }
  0xa6   :  { %1020 = vmatprep.subr.bf16.mxu0 %v1947_v32  ;;  %1061 = vmatprep.subr.bf16.mxu1 %v1949_v35  ;;  %v2011_v32 = vcombine.high %v206_v61, %v210_v24  ;;  %v2013_v33 = vcombine.high %v207_v27, %v211_v28  ;;  %v218_v35 = vld [vmem:[#allocation5 + $0x2f0] sm:$0xff]  ;;  %v2270_v61 = vld [vmem:[#allocation8 + $0xd0] sm:$0xff]  }
  0xa7   :  { %v2018_v47 = vcombine.low %v214_v34, %v218_v35  ;;  %v2267_v22 = vld [vmem:[#allocation8 + $0x8] sm:$0xff]   ;;  %v2271_v24 = vld [vmem:[#allocation8 + $0x10] sm:$0xff]  }
  0xa9   :  { %1021 = vmatpush1.bf16.msra.mxu0 %v1946_v36  ;;  %1062 = vmatpush1.bf16.msra.mxu1 %v1948_v39  ;;  %v215_v36 = vld [vmem:[#allocation5 + $0x2d8] sm:$0xff]  ;;  %v2012_v39 = vcombine.low %v207_v27, %v211_v28  ;;  %v2274_v27 = vld [vmem:[#allocation8 + $0xd8] sm:$0xff]  }
  0xaa   :  { %1022 = vmatprep.subr.bf16.mxu0 %v1955_v40  ;;  %1063 = vmatprep.subr.bf16.mxu1 %v1957_v43  ;;  %v2019_v40 = vcombine.high %v214_v34, %v218_v35  ;;  %v2021_v41 = vcombine.high %v215_v36, %v219_v37  ;;  %v226_v43 = vld [vmem:[#allocation5 + $0x330] sm:$0xff]  ;;  %v2275_v28 = vld [vmem:[#allocation8 + $0x18] sm:$0xff]  }
  0xab   :  { %v2026_v54 = vcombine.low %v222_v42, %v226_v43  ;;  %v2282_v34 = vld [vmem:[#allocation8 + $0xe8] sm:$0xff]  }
  0xac   :  { %v2283_v35 = vld [vmem:[#allocation8 + $0x28] sm:$0xff]  }
  0xad   :  { %1023 = vmatpush1.bf16.msra.mxu0 %v1954_v45  ;;  %1064 = vmatpush1.bf16.msra.mxu1 %v1956_v48  ;;  %v223_v45 = vld [vmem:[#allocation5 + $0x318] sm:$0xff]  ;;  %v2020_v48 = vcombine.low %v215_v36, %v219_v37  ;;  %v2284_v36 = vld [vmem:[#allocation8 + $0xa8] sm:$0xff]  }
  0xae   :  { %1024 = vmatprep.subr.bf16.mxu0 %v1963_v10  ;;  %1065 = vmatprep.subr.bf16.mxu1 %v1965_v51  ;;  %v2027_v10 = vcombine.high %v222_v42, %v226_v43  ;;  %v2029_v49 = vcombine.high %v223_v45, %v227_v46  ;;  %v234_v51 = vld [vmem:[#allocation5 + $0x370] sm:$0xff]  ;;  %v2285_v37 = vld [vmem:[#allocation8 + $0x70] sm:$0xff]   ;;  %v2290_v42 = vld [vmem:[#allocation8 + $0xf8] sm:$0xff]  }
  0xaf   :  { %v2034_v0 = vcombine.low %v230_v50, %v234_v51  ;;  %v2291_v43 = vld [vmem:[#allocation8 + $0x38] sm:$0xff]  }
  0xb1   :  { %1025 = vmatpush1.bf16.msra.mxu0 %v1962_v52  ;;  %1066 = vmatpush1.bf16.msra.mxu1 %v1964_v55  ;;  %v231_v52 = vld [vmem:[#allocation5 + $0x358] sm:$0xff]  ;;  %v2028_v55 = vcombine.low %v223_v45, %v227_v46  ;;  %v2292_v45 = vld [vmem:[#allocation8 + $0xb8] sm:$0xff]   ;;  %v2293_v46 = vld [vmem:[#allocation8 + $0x140] sm:$0xff]  }
  0xb2   :  { %1026 = vmatprep.subr.bf16.mxu0 %v1971_v56  ;;  %1067 = vmatprep.subr.bf16.mxu1 %v1973_v60  ;;  %v2035_v56 = vcombine.high %v230_v50, %v234_v51  ;;  %v2037_v57 = vcombine.high %v231_v52, %v235_v53  ;;  %v242_v60 = vld [vmem:[#allocation5 + $0x3b0] sm:$0xff]  ;;  %v260_v50 = vsub.s32 1, %v2598_v44  ;;  %v268_v51 = vsub.s32 3, %v2598_v44 }
  0xb3   :  { %v2042_v8 = vcombine.low %v238_v59, %v242_v60 }
  0xb5   :  { %1027 = vmatpush1.bf16.msra.mxu0 %v1970_v62  ;;  %1068 = vmatpush1.bf16.msra.mxu1 %v1972_v1  ;;  %v239_v62 = vld [vmem:[#allocation5 + $0x398] sm:$0xff]  ;;  %v2036_v1 = vcombine.low %v231_v52, %v235_v53 }
  0xb6   :  { %1028 = vmatprep.subr.bf16.mxu0 %v1979_v2  ;;  %1069 = vmatprep.subr.bf16.mxu1 %v1981_v5  ;;  %v2043_v2 = vcombine.high %v238_v59, %v242_v60  ;;  %v2045_v3 = vcombine.high %v239_v62, %v243_v63  ;;  %v250_v5 = vld [vmem:[#allocation5 + $0x3f0] sm:$0xff] }
  0xb7   :  { %v2050_v13 = vcombine.low %v246_v4, %v250_v5 }
  0xb9   :  { %1029 = vmatpush1.bf16.msra.mxu0 %v1978_v6  ;;  %1070 = vmatpush1.bf16.msra.mxu1 %v1980_v9  ;;  %v247_v6 = vld [vmem:[#allocation5 + $0x3d8] sm:$0xff]  ;;  %v2044_v9 = vcombine.low %v239_v62, %v243_v63 }
  0xba   :  { %1030 = vmatprep.subr.bf16.mxu0 %v1987_v11  ;;  %1071 = vmatprep.subr.bf16.mxu1 %v1989_v14  ;;  %v2051_v11 = vcombine.high %v246_v4, %v250_v5  ;;  %v2053_v12 = vcombine.high %v247_v6, %v251_v7  ;;  %v2052_v14 = vcombine.low %v247_v6, %v251_v7 }
  0xbd   :  { %1031 = vmatpush1.bf16.msra.mxu0 %v1986_v15  ;;  %1072 = vmatpush1.bf16.msra.mxu1 %v1988_v18  ;;  %v2261_v15 = vld [vmem:[#allocation8 + $0x40] sm:$0xff]  }
  0xbe   :  { %1032 = vmatprep.subr.bf16.mxu0 %v1995_v19  ;;  %1073 = vmatprep.subr.bf16.mxu1 %v1997_v23  ;;  %v2264_v18 = vld [vmem:[#allocation8 + $0x80] sm:$0xff]   ;;  %v2265_v19 = vld [vmem:[#allocation8 + $0x48] sm:$0xff]  }
  0xbf   :  { %v2268_v23 = vld [vmem:[#allocation8 + $0x88] sm:$0xff]  }
  0xc1   :  { %1033 = vmatpush1.bf16.msra.mxu0 %v1994_v58  ;;  %1074 = vmatpush1.bf16.msra.mxu1 %v1996_v25  ;;  %v2269_v58 = vld [vmem:[#allocation8 + $0x50] sm:$0xff]  }
  0xc2   :  { %1034 = vmatprep.subr.bf16.mxu0 %v2003_v26  ;;  %1075 = vmatprep.subr.bf16.mxu1 %v2005_v29  ;;  %v2272_v25 = vld [vmem:[#allocation8 + $0x90] sm:$0xff]   ;;  %v2273_v26 = vld [vmem:[#allocation8 + $0x58] sm:$0xff]   ;;  %v2277_v29 = vld [vmem:[#allocation8 + $0x60] sm:$0xff]  }
  0xc5   :  { %1035 = vmatpush1.bf16.msra.mxu0 %v2002_v30  ;;  %1076 = vmatpush1.bf16.msra.mxu1 %v2004_v31  ;;  %v2278_v30 = vld [vmem:[#allocation8 + $0xe0] sm:$0xff]  }
  0xc6   :  { %1036 = vmatprep.subr.bf16.mxu0 %v2011_v32  ;;  %1077 = vmatprep.subr.bf16.mxu1 %v2013_v33  ;;  %v2279_v31 = vld [vmem:[#allocation8 + $0x20] sm:$0xff]   ;;  %v2281_v33 = vld [vmem:[#allocation8 + $0x68] sm:$0xff]  }
  0xc7   :  { %v2280_v32 = vld [vmem:[#allocation8 + $0xa0] sm:$0xff]  }
  0xc9   :  { %1037 = vmatpush1.bf16.msra.mxu0 %v2010_v38  ;;  %1078 = vmatpush1.bf16.msra.mxu1 %v2012_v39  ;;  %v2286_v38 = vld [vmem:[#allocation8 + $0xf0] sm:$0xff]  }
  0xca   :  { %1038 = vmatprep.subr.bf16.mxu0 %v2019_v40  ;;  %1079 = vmatprep.subr.bf16.mxu1 %v2021_v41  ;;  %v2287_v39 = vld [vmem:[#allocation8 + $0x30] sm:$0xff]   ;;  %v2289_v41 = vld [vmem:[#allocation8 + $0x78] sm:$0xff]  }
  0xcb   :  { %v2288_v40 = vld [vmem:[#allocation8 + $0xb0] sm:$0xff]  }
  0xcd   :  { %1039 = vmatpush1.bf16.msra.mxu0 %v2018_v47  ;;  %1080 = vmatpush1.bf16.msra.mxu1 %v2020_v48  ;;  %v2294_v47 = vld [vmem:[#allocation8 + $0x1c0] sm:$0xff]   ;;  %v256_v48 = vsub.s32 0, %v2598_v44 }
  0xce   :  { %1040 = vmatprep.subr.bf16.mxu0 %v2027_v10  ;;  %1081 = vmatprep.subr.bf16.mxu1 %v2029_v49  ;;  %v2621_v10 = vld [vmem:[#allocation7] sm:$0xff]  ;;  %v264_v49 = vsub.s32 2, %v2598_v44 }
  0xcf   :  { %v257_v52 = vrot.slane %v2621_v10, %v256_v48 }
  0xd0   :  { %v265_v53 = vrot.slane %v2621_v10, %v264_v49 }
  0xd1   :  { %1041 = vmatpush1.bf16.msra.mxu0 %v2026_v54  ;;  %1082 = vmatpush1.bf16.msra.mxu1 %v2028_v55  ;;  %v261_v54 = vrot.slane %v2621_v10, %v260_v50  ;;  %v269_v55 = vrot.slane %v2621_v10, %v268_v51 }
  0xd2   :  { %1042 = vmatprep.subr.bf16.mxu0 %v2035_v56  ;;  %1083 = vmatprep.subr.bf16.mxu1 %v2037_v57 }
  0xd5   :  { %1043 = vmatpush1.bf16.msra.mxu0 %v2034_v0  ;;  %1084 = vmatpush1.bf16.msra.mxu1 %v2036_v1 }
  0xd6   :  { %1044 = vmatprep.subr.bf16.mxu0 %v2043_v2  ;;  %1085 = vmatprep.subr.bf16.mxu1 %v2045_v3 }
  0xd9   :  { %1045 = vmatpush1.bf16.msra.mxu0 %v2042_v8  ;;  %1086 = vmatpush1.bf16.msra.mxu1 %v2044_v9 }
  0xda   :  { %1046 = vmatprep.subr.bf16.mxu0 %v2051_v11  ;;  %1087 = vmatprep.subr.bf16.mxu1 %v2053_v12 }
  0xdd   :  { %1047 = vmatpush1.bf16.msra.mxu0 %v2050_v13  ;;  %1088 = vmatpush1.bf16.msra.mxu1 %v2052_v14  ;;  %v2295_v14 = vld [vmem:[#allocation8 + $0x100] sm:$0xff]  }
  0xde   :  { %2128 = vmatprep.subr.bf16.mxu0 %v2261_v15  ;;  %2150 = vmatprep.subr.bf16.mxu1 %v2262_v16  ;;  %v2296_v16 = vld [vmem:[#allocation8 + $0x180] sm:$0xff]  }
  0xe0   :  { %1049 = vmatmul.mubr.bf16.vlgmr.msra.gmra.mrb[4].mxu0 %v2612_v20  ;;  %1090 = vmatmul.mubr.bf16.vlgmr.msra.gmra.mrb[4].mxu1 %v2612_v20  ;;  %v2276_v20 = vld [vmem:[#allocation8 + $0x98] sm:$0xff]  }
  0xe1   :  { %2129 = vmatpush3.bf16.msra.mxu0 %v2263_v17  ;;  %2151 = vmatpush3.bf16.msra.mxu1 %v2264_v18  ;;  %v2297_v17 = vld [vmem:[#allocation8 + $0x148] sm:$0xff]  }
  0xe2   :  { %2130 = vmatprep.subr.bf16.mxu0 %v2265_v19  ;;  %2152 = vmatprep.subr.bf16.mxu1 %v2266_v21  ;;  %v2298_v18 = vld [vmem:[#allocation8 + $0x1c8] sm:$0xff]  }
  0xe3   :  { %v2299_v19 = vld [vmem:[#allocation8 + $0x108] sm:$0xff]  }
  0xe4   :  { %v2300_v21 = vld [vmem:[#allocation8 + $0x188] sm:$0xff]  }
  0xe5   :  { %2131 = vmatpush3.bf16.msra.mxu0 %v2267_v22  ;;  %2153 = vmatpush3.bf16.msra.mxu1 %v2268_v23  ;;  %v2301_v22 = vld [vmem:[#allocation8 + $0x150] sm:$0xff]  }
  0xe6   :  { %2132 = vmatprep.subr.bf16.mxu0 %v2269_v58  ;;  %2154 = vmatprep.subr.bf16.mxu1 %v2270_v61  ;;  %v2302_v23 = vld [vmem:[#allocation8 + $0x1d0] sm:$0xff]  }
  0xe7   :  { %v2303_v58 = vld [vmem:[#allocation8 + $0x110] sm:$0xff]  }
  0xe8   :  { %v2304_v61 = vld [vmem:[#allocation8 + $0x190] sm:$0xff]  }
  0xe9   :  { %2133 = vmatpush3.bf16.msra.mxu0 %v2271_v24  ;;  %2155 = vmatpush3.bf16.msra.mxu1 %v2272_v25  ;;  %v2305_v24 = vld [vmem:[#allocation8 + $0x158] sm:$0xff]  }
  0xea   :  { %2134 = vmatprep.subr.bf16.mxu0 %v2273_v26  ;;  %2156 = vmatprep.subr.bf16.mxu1 %v2274_v27  ;;  %v2306_v25 = vld [vmem:[#allocation8 + $0x1d8] sm:$0xff]  }
  0xeb   :  { %v2307_v26 = vld [vmem:[#allocation8 + $0x118] sm:$0xff]  }
  0xec   :  { %v2308_v27 = vld [vmem:[#allocation8 + $0x198] sm:$0xff]  }
  0xed   :  { %2135 = vmatpush3.bf16.msra.mxu0 %v2275_v28  ;;  %2157 = vmatpush3.bf16.msra.mxu1 %v2276_v20  ;;  %v2309_v28 = vld [vmem:[#allocation8 + $0x160] sm:$0xff]  }
  0xee   :  { %2136 = vmatprep.subr.bf16.mxu0 %v2277_v29  ;;  %2158 = vmatprep.subr.bf16.mxu1 %v2278_v30  ;;  %v2310_v20 = vld [vmem:[#allocation8 + $0x1e0] sm:$0xff]  }
  0xef   :  { %v2311_v29 = vld [vmem:[#allocation8 + $0x120] sm:$0xff]  }
  0xf0   :  { %v2312_v30 = vld [vmem:[#allocation8 + $0x1a0] sm:$0xff]  }
  0xf1   :  { %2137 = vmatpush3.bf16.msra.mxu0 %v2279_v31  ;;  %2159 = vmatpush3.bf16.msra.mxu1 %v2280_v32  ;;  %v2313_v31 = vld [vmem:[#allocation8 + $0x168] sm:$0xff]  }
  0xf2   :  { %2138 = vmatprep.subr.bf16.mxu0 %v2281_v33  ;;  %2160 = vmatprep.subr.bf16.mxu1 %v2282_v34  ;;  %v2314_v32 = vld [vmem:[#allocation8 + $0x1e8] sm:$0xff]  }
  0xf3   :  { %v2315_v33 = vld [vmem:[#allocation8 + $0x128] sm:$0xff]  }
  0xf4   :  { %v2316_v34 = vld [vmem:[#allocation8 + $0x1a8] sm:$0xff]  }
  0xf5   :  { %2139 = vmatpush3.bf16.msra.mxu0 %v2283_v35  ;;  %2161 = vmatpush3.bf16.msra.mxu1 %v2284_v36  ;;  %v2317_v35 = vld [vmem:[#allocation8 + $0x170] sm:$0xff]  }
  0xf6   :  { %2140 = vmatprep.subr.bf16.mxu0 %v2285_v37  ;;  %2162 = vmatprep.subr.bf16.mxu1 %v2286_v38  ;;  %v2318_v36 = vld [vmem:[#allocation8 + $0x1f0] sm:$0xff]  }
  0xf7   :  { %v2319_v37 = vld [vmem:[#allocation8 + $0x130] sm:$0xff]  }
  0xf8   :  { %v2320_v38 = vld [vmem:[#allocation8 + $0x1b0] sm:$0xff]  }
  0xf9   :  { %2141 = vmatpush3.bf16.msra.mxu0 %v2287_v39  ;;  %2163 = vmatpush3.bf16.msra.mxu1 %v2288_v40  ;;  %v2321_v39 = vld [vmem:[#allocation8 + $0x178] sm:$0xff]  }
  0xfa   :  { %2142 = vmatprep.subr.bf16.mxu0 %v2289_v41  ;;  %2164 = vmatprep.subr.bf16.mxu1 %v2290_v42  ;;  %v2322_v40 = vld [vmem:[#allocation8 + $0x1f8] sm:$0xff]  }
  0xfb   :  { %v2323_v41 = vld [vmem:[#allocation8 + $0x138] sm:$0xff]  }
  0xfc   :  { %v2324_v42 = vld [vmem:[#allocation8 + $0x1b8] sm:$0xff]  }
  0xfd   :  { %2143 = vmatpush3.bf16.msra.mxu0 %v2291_v43  ;;  %2165 = vmatpush3.bf16.msra.mxu1 %v2292_v45  ;;  %v272_v43 = vsub.s32 4, %v2598_v44  ;;  %v280_v45 = vsub.s32 6, %v2598_v44 }
  0xfe   :  { %2172 = vmatprep.subr.bf16.mxu0 %v2293_v46  ;;  %2194 = vmatprep.subr.bf16.mxu1 %v2294_v47  ;;  %v276_v46 = vsub.s32 5, %v2598_v44  ;;  %v284_v47 = vsub.s32 7, %v2598_v44 }
  0xff   :  { %v273_v48 = vrot.slane %v2621_v10, %v272_v43  ;;  %v281_v49 = vrot.slane %v2621_v10, %v280_v45  ;;  %v2119_v43 = vld [vmem:[%s2664_s6] ss:$0 sm:$0xff] }
 0x100   :  { %v277_v50 = vrot.slane %v2621_v10, %v276_v46  ;;  %v285_v51 = vrot.slane %v2621_v10, %v284_v47 }
 0x173   :  { %v968_v56 = vpop.f32.mrb[0].mxu0  ;;  %v1009_v59 = vpop.f32.mrb[0].mxu1 }
 0x174   :  { %v969_v57 = vadd.f32 %v968_v56, %v257_v52  ;;  %v970_v60 = vpop.f32.mrb[1].mxu0  ;;  %v1010_v62 = vadd.f32 %v1009_v59, %v265_v53  ;;  %v1011_v0 = vpop.f32.mrb[1].mxu1 }
 0x175   :  { %v971_v63 = vadd.f32 %v970_v60, %v261_v54  ;;  %v972_v1 = vpop.f32.mrb[2].mxu0  ;;  %v1012_v3 = vadd.f32 %v1011_v0, %v269_v55  ;;  %v1013_v4 = vpop.f32.mrb[2].mxu1 }
 0x176   :  { %v1098_v2 = vmax.f32 %v969_v57, 0.0  ;;  %v973_v5 = vpop.f32.mrb[3].mxu0  ;;  %v1100_v6 = vmax.f32 %v1010_v62, 0.0  ;;  %v1014_v8 = vpop.f32.mrb[3].mxu1 }
 0x177   :  { %v1099_v7 = vmax.f32 %v971_v63, 0.0  ;;  %v1101_v11 = vmax.f32 %v1012_v3, 0.0  ;;  %v2325_v8 = vld [vmem:[#allocation10] sm:$0xff]  }
 0x178   :  { %v1106_v9 = vpack.c.bf16 %v1098_v2, %v1098_v2  ;;  %v1108_v12 = vpack.c.bf16 %v1100_v6, %v1100_v6 }
 0x179   :  { %v1107_v13 = vpack.c.bf16 %v1099_v7, %v1099_v7  ;;  %v1109_v15 = vpack.c.bf16 %v1101_v11, %v1101_v11  ;;  %v2326_v11 = vld [vmem:[#allocation10 + $0x8] sm:$0xff]  }
 0x17b   :  { %1665 = vmatprep.mubr.bf16.mxu0 %v1107_v13  ;;  %1705 = vmatprep.mubr.bf16.mxu1 %v1109_v15  ;;  %v2328_v13 = vld [vmem:[#allocation10 + $0x18] sm:$0xff]   ;;  %v2330_v15 = vld [vmem:[#allocation10 + $0x28] sm:$0xff]  }
 0x17c   :  { %1666 = vmatmul.mubr.bf16.vlgmr.msra.gmra.mrb[8].mxu0 %v1106_v9  ;;  %1706 = vmatmul.mubr.bf16.vlgmr.msra.gmra.mrb[8].mxu1 %v1108_v12  ;;  %v2484_v9 = vmov 0.0   ;;  %v2327_v12 = vld [vmem:[#allocation10 + $0x10] sm:$0xff]  }
 0x17d   :  { %2173 = vmatpush3.bf16.msra.mxu0 %v2295_v14  ;;  %2195 = vmatpush3.bf16.msra.mxu1 %v2296_v16  ;;  %v2329_v14 = vld [vmem:[#allocation10 + $0x20] sm:$0xff]   ;;  %v2331_v16 = vld [vmem:[#allocation10 + $0x30] sm:$0xff]  }
 0x17e   :  { %2174 = vmatprep.subr.bf16.mxu0 %v2297_v17  ;;  %2196 = vmatprep.subr.bf16.mxu1 %v2298_v18  ;;  %v2332_v17 = vld [vmem:[#allocation10 + $0x38] sm:$0xff]  }
 0x181   :  { %2175 = vmatpush3.bf16.msra.mxu0 %v2299_v19  ;;  %2197 = vmatpush3.bf16.msra.mxu1 %v2300_v21  ;;  %v2054_v21 = vld [vmem:[%s2662_s4] ss:$0 sm:$0xff] }
 0x182   :  { %2176 = vmatprep.subr.bf16.mxu0 %v2301_v22  ;;  %2198 = vmatprep.subr.bf16.mxu1 %v2302_v23 }
 0x185   :  { %2177 = vmatpush3.bf16.msra.mxu0 %v2303_v58  ;;  %2199 = vmatpush3.bf16.msra.mxu1 %v2304_v61 }
 0x186   :  { %2178 = vmatprep.subr.bf16.mxu0 %v2305_v24  ;;  %2200 = vmatprep.subr.bf16.mxu1 %v2306_v25 }
 0x189   :  { %2179 = vmatpush3.bf16.msra.mxu0 %v2307_v26  ;;  %2201 = vmatpush3.bf16.msra.mxu1 %v2308_v27 }
 0x18a   :  { %2180 = vmatprep.subr.bf16.mxu0 %v2309_v28  ;;  %2202 = vmatprep.subr.bf16.mxu1 %v2310_v20 }
 0x18d   :  { %2181 = vmatpush3.bf16.msra.mxu0 %v2311_v29  ;;  %2203 = vmatpush3.bf16.msra.mxu1 %v2312_v30 }
 0x18e   :  { %2182 = vmatprep.subr.bf16.mxu0 %v2313_v31  ;;  %2204 = vmatprep.subr.bf16.mxu1 %v2314_v32 }
 0x191   :  { %2183 = vmatpush3.bf16.msra.mxu0 %v2315_v33  ;;  %2205 = vmatpush3.bf16.msra.mxu1 %v2316_v34 }
 0x192   :  { %2184 = vmatprep.subr.bf16.mxu0 %v2317_v35  ;;  %2206 = vmatprep.subr.bf16.mxu1 %v2318_v36 }
 0x195   :  { %2185 = vmatpush3.bf16.msra.mxu0 %v2319_v37  ;;  %2207 = vmatpush3.bf16.msra.mxu1 %v2320_v38 }
 0x196   :  { %2186 = vmatprep.subr.bf16.mxu0 %v2321_v39  ;;  %2208 = vmatprep.subr.bf16.mxu1 %v2322_v40 }
 0x199   :  { %2187 = vmatpush3.bf16.msra.mxu0 %v2323_v41  ;;  %2209 = vmatpush3.bf16.msra.mxu1 %v2324_v42 }
 0x19a   :  { %2225 = vmatprep.subr.bf16.mxu0 %v2484_v9 }
 0x1b3   :  { %v1050_v52 = vpop.f32.mrb[4].mxu0  ;;  %v1091_v54 = vpop.f32.mrb[4].mxu1 }
 0x1b4   :  { %v1051_v53 = vadd.f32 %v1050_v52, %v273_v48  ;;  %v1052_v55 = vpop.f32.mrb[5].mxu0  ;;  %v1092_v56 = vadd.f32 %v1091_v54, %v281_v49  ;;  %v1093_v59 = vpop.f32.mrb[5].mxu1 }
 0x1b5   :  { %v1053_v57 = vadd.f32 %v1052_v55, %v277_v50  ;;  %v1054_v60 = vpop.f32.mrb[6].mxu0  ;;  %v1094_v63 = vadd.f32 %v1093_v59, %v285_v51  ;;  %v1095_v0 = vpop.f32.mrb[6].mxu1 }
 0x1b6   :  { %v1102_v62 = vmax.f32 %v1051_v53, 0.0  ;;  %v1055_v44 = vpop.f32.mrb[7].mxu0  ;;  %v1104_v1 = vmax.f32 %v1092_v56, 0.0  ;;  %v1096_v3 = vpop.f32.mrb[7].mxu1 }
 0x1b7   :  { %v1103_v2 = vmax.f32 %v1053_v57, 0.0  ;;  %v1105_v4 = vmax.f32 %v1094_v63, 0.0 }
 0x1b8   :  { %v1112_v5 = vpack.c.bf16 %v1104_v1, %v1104_v1  ;;  %v1110_v7 = vpack.c.bf16 %v1102_v62, %v1102_v62 }
 0x1b9   :  { %v1111_v6 = vpack.c.bf16 %v1103_v2, %v1103_v2  ;;  %v1113_v10 = vpack.c.bf16 %v1105_v4, %v1105_v4 }
 0x1bb   :  { %1745 = vmatprep.mubr.bf16.mxu0 %v1111_v6  ;;  %1785 = vmatprep.mubr.bf16.mxu1 %v1113_v10 }
 0x1bc   :  { %1746 = vmatmul.mubr.bf16.vlgmr.msra.gmra.mrb[12].mxu0 %v1110_v7  ;;  %1786 = vmatmul.mubr.bf16.vlgmr.msra.gmra.mrb[12].mxu1 %v1112_v5 }
 0x1bd   :  { %2226 = vmatpush3.bf16.msra.mxu0 %v2325_v8  ;;  %2241 = vmatprep.mubr.msk.bf16.mxu0 %vm2485_vm0, %v2484_v9 }
 0x1be   :  { %2227 = vmatprep.subr.bf16.mxu0 %v2484_v9 }
 0x1c1   :  { %2228 = vmatpush3.bf16.msra.mxu0 %v2326_v11 }
 0x1c2   :  { %2229 = vmatprep.subr.bf16.mxu0 %v2484_v9 }
 0x1c5   :  { %2230 = vmatpush3.bf16.msra.mxu0 %v2327_v12 }
 0x1c6   :  { %2231 = vmatprep.subr.bf16.mxu0 %v2484_v9 }
 0x1c9   :  { %2232 = vmatpush3.bf16.msra.mxu0 %v2328_v13 }
 0x1ca   :  { %2233 = vmatprep.subr.bf16.mxu0 %v2484_v9 }
 0x1cd   :  { %2234 = vmatpush3.bf16.msra.mxu0 %v2329_v14 }
 0x1ce   :  { %2235 = vmatprep.subr.bf16.mxu0 %v2484_v9 }
 0x1d1   :  { %2236 = vmatpush3.bf16.msra.mxu0 %v2330_v15 }
 0x1d2   :  { %2237 = vmatprep.subr.bf16.mxu0 %v2484_v9 }
 0x1d5   :  { %2238 = vmatpush3.bf16.msra.mxu0 %v2331_v16 }
 0x1d6   :  { %2239 = vmatprep.subr.bf16.mxu0 %v2484_v9 }
 0x1d9   :  { %2240 = vmatpush3.bf16.msra.mxu0 %v2332_v17 }
 0x24f   :  { %v2144_v18 = vpop.f32.mrb[8].mxu0  ;;  %v2166_v19 = vpop.f32.mrb[8].mxu1 }
 0x250   :  { %v2145_v22 = vpop.f32.mrb[9].mxu0  ;;  %v2167_v58 = vpop.f32.mrb[9].mxu1 }
 0x251   :  { %v2146_v23 = vadd.f32 %v2145_v22, %v2144_v18  ;;  %v2147_v61 = vpop.f32.mrb[10].mxu0  ;;  %v2168_v24 = vadd.f32 %v2167_v58, %v2166_v19  ;;  %v2169_v25 = vpop.f32.mrb[10].mxu1 }
 0x252   :  { %v2148_v26 = vpop.f32.mrb[11].mxu0  ;;  %v2170_v28 = vpop.f32.mrb[11].mxu1 }
 0x253   :  { %v1668_v27 = vadd.f32 %v2146_v23, %v2054_v21 }
 0x255   :  { %v1708_v20 = vadd.f32 %v2168_v24, %v1668_v27 }
 0x28f   :  { %v2188_v29 = vpop.f32.mrb[12].mxu0  ;;  %v2210_v30 = vpop.f32.mrb[12].mxu1 }
 0x290   :  { %v2189_v31 = vpop.f32.mrb[13].mxu0  ;;  %v2211_v33 = vpop.f32.mrb[13].mxu1 }
 0x291   :  { %v2190_v32 = vadd.f32 %v2189_v31, %v2188_v29  ;;  %v2191_v34 = vpop.f32.mrb[14].mxu0  ;;  %v2212_v35 = vadd.f32 %v2211_v33, %v2210_v30  ;;  %v2213_v36 = vpop.f32.mrb[14].mxu1 }
 0x292   :  { %v2192_v37 = vpop.f32.mrb[15].mxu0  ;;  %v2214_v39 = vpop.f32.mrb[15].mxu1 }
 0x293   :  { %v1748_v38 = vadd.f32 %v2190_v32, %v1708_v20 }
 0x295   :  { %v1788_v40 = vadd.f32 %v2212_v35, %v1748_v38 }
 0x297   :  { %v1793_v41 = vmax.f32 %v1788_v40, 0.0 }
 0x299   :  { %v1794_v42 = vpack.c.bf16 %v1793_v41, %v1793_v41 }
 0x29b   :  { %2242 = vmatmul.mubr.bf16.vlgmr.msra.gmra.mrb[16].mxu0 %v1794_v42 }
 0x36e   :  { %v1900_v45 = vpop.f32.mrb[16].mxu0 }
 0x36f   :  { %v1901_v46 = vadd.f32 %v2119_v43, %v1900_v45  ;;  %v2243_v47 = vpop.f32.mrb[17].mxu0 }
 0x370   :  { %v1903_v48 = vpop.f32.mrb[18].mxu0 }
 0x371   :  { %1906 = vst [vmem:[#allocation11] sm:$0xff] %v1901_v46  ;;  %v2244_v49 = vpop.f32.mrb[19].mxu0 }
 0x372   :  { %1911 = vsyncadd [#allocation4], 96  ;;  %s2486_s19 = smov [#allocation11]  }
 0x373   :  { %s1912_s20 = sshll.u32 %s2486_s19, 4  ;;  %s1913_s20 = int_to_ptr.vmem [resolvable:$true] %s1912_s20 }
 0x374   :  { %s2445_s21 = scalar_lea.vmem %s1913_s20, 32  ;;  %s2449_s22 = scalar_lea.vmem %s1913_s20, 128 }
 0x375   :  { %p2446_p12 = scmp.ne.s32.totalorder %s1913_s20, %s2445_s21  ;;  %p2450_p13 = scmp.lt.s32.totalorder %s1913_s20, %s1913_s20 }
 0x376   :  { %p2451_p0 = scmp.lt.s32.totalorder %s2449_s22, %s2445_s21 }
 0x378   :  { %p2452_p1 = por %p2451_p0, %p2450_p13 }
 0x37a   :  { %p2453_p2 = pnand %p2452_p1, %p2446_p12 }
 0x37c   :  { %2456 = shalt.err (!%p2453_p2)
}
 0x37d   :  { %s2457_s24 = scalar_lea.hbm %s2665_s7, 32 }
 0x37e   :  { %p2458_p3 = scmp.ne.s32.totalorder %s2665_s7, %s2457_s24  ;;  %p2461_p4 = scmp.lt.u32.totalorder %s2457_s24, %s2665_s7 }
 0x380   :  { %p2463_p5 = pnand %p2461_p4, %p2458_p3 }
 0x382   :  { %2466 = shalt.err (!%p2463_p5)
}
 0x383   :  { %s2487_s30 = smov 2  }
 0x384   :  { %1918 = dma.vmem_to_hbm [thread:$0]  %s1913_s20, 32, %s2665_s7, [#allocation4], %s2477_s12, %s2477_s12, %s2487_s30  }
 0x385   :  { %2473 = dma.done.wait [#allocation4], 128  }
 0x386   :  { %2474 = vsyncadd [#allocation4], 4294967168 }
 0x387   :  { %1922 = vsyncpa [#allocation3], 1 }
 0x388   :  { %1923 = vsyncpa [#allocation6], 1 }
 0x389   :  { %1924 = vsyncpa [#allocation9], 1 }
 0x38a   :  { %1925 = vsyncpa [#allocation4], 1 }

</bundles_post_ra>
